<compile_context>
chip_gen: v5e
topology: v5e:2x2
jax: 0.10.0
libtpu: 0.0.40
codegen_flags: <defaults>
</compile_context>

<pallas_src>
import math
import functools

import jax
import jax.numpy as jnp
from jax.experimental import pallas as pl
from jax.experimental.pallas import tpu as pltpu


_VMEM_LIMIT_BYTES = 48 * 1024 * 1024  # safe on v5e/v6e (128 MiB) and v7x (64 MiB)


def _pick_tile(dim, pref):
    """Largest usable tile: full dim if small, otherwise the preferred tile if it divides."""
    if dim <= pref:
        return dim
    if dim % pref == 0:
        return pref
    # TODO(synk): ragged dims would need masking; fall back to the full dim.
    return dim


# ----------------------------------------------------------------------------
# Kernel 1: tiled dense linear  y = x @ W_t + b   (W_t stored as (in, out))
#   grid = (B, M//tm, N//tn, K//tk), f32 VMEM accumulator, bf16 MXU operands.
# ----------------------------------------------------------------------------
def _linear_kernel(x_ref, w_ref, b_ref, o_ref, acc_ref):
    k = pl.program_id(3)

    @pl.when(k == 0)
    def _():
        acc_ref[...] = jnp.zeros_like(acc_ref)

    xb = x_ref[0].astype(jnp.bfloat16)        # (tm, tk)
    wb = w_ref[...].astype(jnp.bfloat16)      # (tk, tn)
    acc_ref[...] += jnp.dot(xb, wb, preferred_element_type=jnp.float32)

    @pl.when(k == pl.num_programs(3) - 1)
    def _():
        o_ref[0] = acc_ref[...] + b_ref[...]  # bias broadcast (1, tn) -> (tm, tn)


def linear_pallas(x, w_t, b, *, tm=256, tn=256, tk=512):
    B, M, K_in = x.shape
    K_w, N = w_t.shape
    assert K_w == K_in
    tm = _pick_tile(M, tm)
    tn = _pick_tile(N, tn)
    tk = _pick_tile(K_in, tk)

    return pl.pallas_call(
        _linear_kernel,
        out_shape=jax.ShapeDtypeStruct((B, M, N), jnp.float32),
        grid_spec=pltpu.PrefetchScalarGridSpec(
            num_scalar_prefetch=0,
            grid=(B, M // tm, N // tn, K_in // tk),
            in_specs=[
                pl.BlockSpec((1, tm, tk), lambda b, m, n, k: (b, m, k)),
                pl.BlockSpec((tk, tn), lambda b, m, n, k: (k, n)),
                pl.BlockSpec((1, tn), lambda b, m, n, k: (0, n)),
            ],
            out_specs=pl.BlockSpec((1, tm, tn), lambda b, m, n, k: (b, m, n)),
            scratch_shapes=[pltpu.VMEM((tm, tn), jnp.float32)],
        ),
        compiler_params=pltpu.CompilerParams(
            dimension_semantics=("parallel", "parallel", "parallel", "arbitrary"),
            vmem_limit_bytes=_VMEM_LIMIT_BYTES,
        ),
    )(x, w_t, b.reshape(1, N))


# ----------------------------------------------------------------------------
# Kernel 2: cross-attention over a tile of query rows, all heads per step.
#   q:  (1, tq, C)      channel-packed (head h lives in lanes [h*hd, (h+1)*hd))
#   kv: (1, T_E, 2C)    fused K (first C lanes) and V (last C lanes)
#   outputs: y (1, tq, C), att_mean (1, tq, T_E)
# ----------------------------------------------------------------------------
def _cross_attn_kernel(q_ref, kv_ref, y_ref, attm_ref, *, n_head, head_dim):
    C = n_head * head_dim
    scale = 1.0 / math.sqrt(head_dim)

    # Fold the softmax scale into q (O(T*C) instead of O(H*T*T_E) multiplies).
    q_s = (q_ref[0] * scale).astype(jnp.bfloat16)   # (tq, C)   bf16 for MXU
    kv_b = kv_ref[0].astype(jnp.bfloat16)           # (T_E, 2C) bf16 for MXU

    att_acc = None
    y_parts = []
    for h in range(n_head):  # static unroll; H matmuls pipelined on the MXU
        lo = h * head_dim
        hi = lo + head_dim
        qh = q_s[:, lo:hi]              # (tq, hd)
        kh = kv_b[:, lo:hi]             # (T_E, hd)
        vh = kv_b[:, C + lo:C + hi]     # (T_E, hd)

        # q @ k^T with contraction over the last dim of both (no explicit k.T).
        s = jax.lax.dot_general(
            qh, kh, (((1,), (1,)), ((), ())),
            preferred_element_type=jnp.float32)      # (tq, T_E) f32

        # Numerically stable softmax; divide replaced by EUP approx reciprocal.
        s = s - jnp.max(s, axis=-1, keepdims=True)
        p = jnp.exp(s)
        denom = jnp.sum(p, axis=-1, keepdims=True)
        att = p * pl.reciprocal(denom, approx=True)  # (tq, T_E) f32

        att_acc = att if att_acc is None else att_acc + att

        # attn_drop is identity (eval mode).
        yh = jnp.dot(att.astype(jnp.bfloat16), vh,
                     preferred_element_type=jnp.float32)  # (tq, hd) f32
        y_parts.append(yh)

    # Lane-dense single store of the full (tq, C) slab.
    y_ref[0] = jnp.concatenate(y_parts, axis=-1)
    attm_ref[0] = att_acc * (1.0 / n_head)


def cross_attention_pallas(q, kv, *, n_head, tq_pref=256):
    B, T, C = q.shape
    _, T_E, C2 = kv.shape
    assert C2 == 2 * C
    hd = C // n_head
    tq = _pick_tile(T, tq_pref)

    kernel = functools.partial(_cross_attn_kernel, n_head=n_head, head_dim=hd)
    return pl.pallas_call(
        kernel,
        out_shape=(
            jax.ShapeDtypeStruct((B, T, C), jnp.float32),
            jax.ShapeDtypeStruct((B, T, T_E), jnp.float32),
        ),
        grid_spec=pltpu.PrefetchScalarGridSpec(
            num_scalar_prefetch=0,
            grid=(B, T // tq),
            in_specs=[
                pl.BlockSpec((1, tq, C), lambda b, i: (b, i, 0)),
                pl.BlockSpec((1, T_E, C2), lambda b, i: (b, 0, 0)),
            ],
            out_specs=(
                pl.BlockSpec((1, tq, C), lambda b, i: (b, i, 0)),
                pl.BlockSpec((1, tq, T_E), lambda b, i: (b, i, 0)),
            ),
        ),
        compiler_params=pltpu.CompilerParams(
            dimension_semantics=("parallel", "parallel"),
            vmem_limit_bytes=_VMEM_LIMIT_BYTES,
        ),
    )(q, kv)


# ----------------------------------------------------------------------------
# Module params + forward
# ----------------------------------------------------------------------------
def init_params(key, n_embd, condition_embd):
    # Weights stored pre-transposed as (in_features, out_features).
    # K and V projections are stored FUSED: (condition_embd, 2*n_embd).
    ks = jax.random.split(key, 8)

    def lin(kw, kb, fan_in, fan_out):
        std = 1.0 / math.sqrt(fan_in)
        w_t = jax.random.uniform(kw, (fan_in, fan_out), jnp.float32, -std, std)
        b = jax.random.uniform(kb, (fan_out,), jnp.float32, -std, std)
        return w_t, b

    w_k, b_k = lin(ks[0], ks[1], condition_embd, n_embd)
    w_v, b_v = lin(ks[2], ks[3], condition_embd, n_embd)
    return {
        "kv": (jnp.concatenate([w_k, w_v], axis=1),
               jnp.concatenate([b_k, b_v], axis=0)),
        "query": lin(ks[4], ks[5], n_embd, n_embd),
        "proj": lin(ks[6], ks[7], n_embd, n_embd),
    }


@functools.partial(jax.jit, static_argnames=("n_head",))
def cross_attention_forward(params, x, encoder_output, mask=None, *, n_head):
    # `mask` and `causal` are unused in the PyTorch forward; kept for parity.
    B, T, C = x.shape
    assert C % n_head == 0

    q = linear_pallas(x, *params["query"])                 # (B, T, C)
    kv = linear_pallas(encoder_output, *params["kv"])      # (B, T_E, 2C) fused K|V

    y, att_mean = cross_attention_pallas(q, kv, n_head=n_head)

    # resid_drop is identity (eval mode)
    y = linear_pallas(y, *params["proj"])
    return y, att_mean


# ----------------------------------------------------------------------------
# Reference (plain JAX, f32) for verification
# ----------------------------------------------------------------------------
def reference_forward(params, x, encoder_output, n_head):
    B, T, C = x.shape
    _, T_E, _ = encoder_output.shape
    hd = C // n_head
    w_q, b_q = params["query"]
    w_kv, b_kv = params["kv"]
    w_p, b_p = params["proj"]

    q = x @ w_q + b_q
    kv = encoder_output @ w_kv + b_kv
    k, v = kv[..., :C], kv[..., C:]

    def heads(t, L):
        return t.reshape(B, L, n_head, hd).transpose(0, 2, 1, 3)

    qh, kh, vh = heads(q, T), heads(k, T_E), heads(v, T_E)
    att = (qh @ jnp.swapaxes(kh, -2, -1)) * (1.0 / math.sqrt(hd))
    att = jax.nn.softmax(att, axis=-1)
    y = att @ vh
    y = y.transpose(0, 2, 1, 3).reshape(B, T, C)
    att_mean = att.mean(axis=1)
    y = y @ w_p + b_p
    return y, att_mean


if __name__ == "__main__":
    B, T, T_E = 2, 8, 16
    n_embd, condition_embd, n_head = 32, 48, 4

    key = jax.random.PRNGKey(0)
    k_params, k_x, k_enc = jax.random.split(key, 3)
    params = init_params(k_params, n_embd, condition_embd)
    x = jax.random.normal(k_x, (B, T, n_embd), jnp.float32)
    encoder_output = jax.random.normal(k_enc, (B, T_E, condition_embd), jnp.float32)

    y, att_mean = cross_attention_forward(params, x, encoder_output, n_head=n_head)
    jax.block_until_ready((y, att_mean))

    y_ref, att_ref = reference_forward(params, x, encoder_output, n_head)
    assert y.shape == (B, T, n_embd) and att_mean.shape == (B, T, T_E)
    # bf16 MXU operands + approx reciprocal -> slightly looser tolerances than f32.
    assert jnp.allclose(y, y_ref, atol=5e-2, rtol=5e-2), float(jnp.max(jnp.abs(y - y_ref)))
    assert jnp.allclose(att_mean, att_ref, atol=3e-2, rtol=3e-2), float(
        jnp.max(jnp.abs(att_mean - att_ref)))

    print("KERNEL_OK")
</pallas_src>

<mosaic_0001>
module attributes {stable_mosaic.version = 11 : i64} {
  func.func @_linear_kernel(%arg0: i32, %arg1: i32, %arg2: i32, %arg3: i32, %arg4: memref<1x8x32xf32, #tpu.memory_space<vmem>>, %arg5: memref<32x32xf32, #tpu.memory_space<vmem>>, %arg6: memref<1x32xf32, #tpu.memory_space<vmem>>, %arg7: memref<1x8x32xf32, #tpu.memory_space<vmem>>, %arg8: memref<8x32xf32, #tpu.memory_space<vmem>>) attributes {dimension_semantics = [#tpu.dimension_semantics<parallel>, #tpu.dimension_semantics<parallel>, #tpu.dimension_semantics<parallel>, #tpu.dimension_semantics<arbitrary>], iteration_bounds = array<i64: 2, 1, 1, 1>, scalar_prefetch = 0 : i64, scratch_operands = 1 : i64, tpu.core_type = #tpu.core_type<tc>, window_params = [{transform_indices = @transform_0, window_bounds = array<i64: 1, 8, 32>}, {transform_indices = @transform_1, window_bounds = array<i64: 32, 32>}, {transform_indices = @transform_2, window_bounds = array<i64: 1, 32>}, {transform_indices = @transform_3, window_bounds = array<i64: 1, 8, 32>}]} {
    %c0_i32 = arith.constant 0 : i32
    %0 = arith.cmpi eq, %arg3, %c0_i32 : i32
    %1 = arith.extui %0 : i1 to i32
    %c0_i32_0 = arith.constant 0 : i32
    %2 = arith.cmpi ne, %1, %c0_i32_0 : i32
    scf.if %2 {
      %cst_11 = arith.constant 0.000000e+00 : f32
      %15 = vector.broadcast %cst_11 : f32 to vector<8x32xf32>
      %c0_12 = arith.constant 0 : index
      %c0_13 = arith.constant 0 : index
      %16 = vector.load %arg8[%c0_12, %c0_13] : memref<8x32xf32, #tpu.memory_space<vmem>>, vector<8x32xf32>
      tpu.vector_store %arg8[%c0_12, %c0_13], %15 {strides = array<i32>} : memref<8x32xf32, #tpu.memory_space<vmem>>, vector<8x32xf32>,
    } else {
    }
    %c0 = arith.constant 0 : index
    %c0_1 = arith.constant 0 : index
    %c0_2 = arith.constant 0 : index
    %3 = vector.load %arg4[%c0, %c0_1, %c0_2] : memref<1x8x32xf32, #tpu.memory_space<vmem>>, vector<1x8x32xf32>
    %4 = vector.shape_cast %3 : vector<1x8x32xf32> to vector<8x32xf32>
    %5 = arith.truncf %4 : vector<8x32xf32> to vector<8x32xbf16>
    %c0_3 = arith.constant 0 : index
    %c0_4 = arith.constant 0 : index
    %6 = vector.load %arg5[%c0_3, %c0_4] : memref<32x32xf32, #tpu.memory_space<vmem>>, vector<32x32xf32>
    %7 = arith.truncf %6 : vector<32x32xf32> to vector<32x32xbf16>
    %c0_5 = arith.constant 0 : index
    %c0_6 = arith.constant 0 : index
    %8 = vector.load %arg8[%c0_5, %c0_6] : memref<8x32xf32, #tpu.memory_space<vmem>>, vector<8x32xf32>
    %cst = arith.constant dense<0.000000e+00> : vector<8x32xf32>
    %9 = tpu.matmul %5, %7, %cst {dimension_numbers = #tpu.dot_dimension_numbers<[1], [0], [0], [1], [0, 0, 1, 1], [], []>} : vector<8x32xbf16>, vector<32x32xbf16>, vector<8x32xf32> -> vector<8x32xf32>
    %10 = arith.addf %8, %9 : vector<8x32xf32>
    %c0_7 = arith.constant 0 : index
    %c0_8 = arith.constant 0 : index
    %11 = vector.load %arg8[%c0_7, %c0_8] : memref<8x32xf32, #tpu.memory_space<vmem>>, vector<8x32xf32>
    tpu.vector_store %arg8[%c0_7, %c0_8], %10 {strides = array<i32>} : memref<8x32xf32, #tpu.memory_space<vmem>>, vector<8x32xf32>,
    %c0_i32_9 = arith.constant 0 : i32
    %12 = arith.cmpi eq, %arg3, %c0_i32_9 : i32
    %13 = arith.extui %12 : i1 to i32
    %c0_i32_10 = arith.constant 0 : i32
    %14 = arith.cmpi ne, %13, %c0_i32_10 : i32
    scf.if %14 {
      %c0_11 = arith.constant 0 : index
      %c0_12 = arith.constant 0 : index
      %15 = vector.load %arg8[%c0_11, %c0_12] : memref<8x32xf32, #tpu.memory_space<vmem>>, vector<8x32xf32>
      %c0_13 = arith.constant 0 : index
      %c0_14 = arith.constant 0 : index
      %16 = vector.load %arg6[%c0_13, %c0_14] : memref<1x32xf32, #tpu.memory_space<vmem>>, vector<1x32xf32>
      %17 = vector.broadcast %16 : vector<1x32xf32> to vector<8x32xf32>
      %18 = arith.addf %15, %17 : vector<8x32xf32>
      %c0_15 = arith.constant 0 : index
      %c0_16 = arith.constant 0 : index
      %c0_17 = arith.constant 0 : index
      %19 = vector.load %arg7[%c0_15, %c0_16, %c0_17] : memref<1x8x32xf32, #tpu.memory_space<vmem>>, vector<1x8x32xf32>
      %20 = vector.shape_cast %19 : vector<1x8x32xf32> to vector<8x32xf32>
      %21 = vector.shape_cast %18 : vector<8x32xf32> to vector<1x8x32xf32>
      tpu.vector_store %arg7[%c0_15, %c0_16, %c0_17], %21 {strides = array<i32>} : memref<1x8x32xf32, #tpu.memory_space<vmem>>, vector<1x8x32xf32>,
    } else {
    }
    return
  }
  func.func @transform_0(%arg0: i32, %arg1: i32, %arg2: i32, %arg3: i32) -> (i32, i32, i32) {
    %c0_i32 = arith.constant 0 : i32
    return %arg0, %arg1, %arg3 : i32, i32, i32
  }
  func.func @transform_1(%arg0: i32, %arg1: i32, %arg2: i32, %arg3: i32) -> (i32, i32) {
    %c0_i32 = arith.constant 0 : i32
    return %arg3, %arg2 : i32, i32
  }
  func.func @transform_2(%arg0: i32, %arg1: i32, %arg2: i32, %arg3: i32) -> (i32, i32) {
    %c0_i32 = arith.constant 0 : i32
    %c0_i32_0 = arith.constant 0 : i32
    return %c0_i32, %arg2 : i32, i32
  }
  func.func @transform_3(%arg0: i32, %arg1: i32, %arg2: i32, %arg3: i32) -> (i32, i32, i32) {
    %c0_i32 = arith.constant 0 : i32
    return %arg0, %arg1, %arg2 : i32, i32, i32
  }
}

module attributes {stable_mosaic.version = 11 : i64} {
  func.func @_cross_attn_kernel(%arg0: i32, %arg1: i32, %arg2: memref<1x8x32xf32, #tpu.memory_space<vmem>>, %arg3: memref<1x16x64xf32, #tpu.memory_space<vmem>>, %arg4: memref<1x8x32xf32, #tpu.memory_space<vmem>>, %arg5: memref<1x8x16xf32, #tpu.memory_space<vmem>>) attributes {dimension_semantics = [#tpu.dimension_semantics<parallel>, #tpu.dimension_semantics<parallel>], iteration_bounds = array<i64: 2, 1>, scalar_prefetch = 0 : i64, scratch_operands = 0 : i64, tpu.core_type = #tpu.core_type<tc>, window_params = [{transform_indices = @transform_0, window_bounds = array<i64: 1, 8, 32>}, {transform_indices = @transform_1, window_bounds = array<i64: 1, 16, 64>}, {transform_indices = @transform_2, window_bounds = array<i64: 1, 8, 32>}, {transform_indices = @transform_3, window_bounds = array<i64: 1, 8, 16>}]} {
    %c0 = arith.constant 0 : index
    %c0_0 = arith.constant 0 : index
    %c0_1 = arith.constant 0 : index
    %0 = vector.load %arg2[%c0, %c0_0, %c0_1] : memref<1x8x32xf32, #tpu.memory_space<vmem>>, vector<1x8x32xf32>
    %1 = vector.shape_cast %0 : vector<1x8x32xf32> to vector<8x32xf32>
    %cst = arith.constant 0.353553385 : f32
    %2 = vector.broadcast %cst : f32 to vector<8x32xf32>
    %3 = arith.mulf %1, %2 : vector<8x32xf32>
    %4 = arith.truncf %3 : vector<8x32xf32> to vector<8x32xbf16>
    %c0_2 = arith.constant 0 : index
    %c0_3 = arith.constant 0 : index
    %c0_4 = arith.constant 0 : index
    %5 = vector.load %arg3[%c0_2, %c0_3, %c0_4] : memref<1x16x64xf32, #tpu.memory_space<vmem>>, vector<1x16x64xf32>
    %6 = vector.shape_cast %5 : vector<1x16x64xf32> to vector<16x64xf32>
    %7 = arith.truncf %6 : vector<16x64xf32> to vector<16x64xbf16>
    %8 = vector.extract_strided_slice %4 {offsets = [0, 0], sizes = [8, 8], strides = [1, 1]} : vector<8x32xbf16> to vector<8x8xbf16>
    %9 = vector.extract_strided_slice %7 {offsets = [0, 0], sizes = [16, 8], strides = [1, 1]} : vector<16x64xbf16> to vector<16x8xbf16>
    %10 = vector.extract_strided_slice %7 {offsets = [0, 32], sizes = [16, 8], strides = [1, 1]} : vector<16x64xbf16> to vector<16x8xbf16>
    %cst_5 = arith.constant dense<0.000000e+00> : vector<8x16xf32>
    %11 = tpu.matmul %8, %9, %cst_5 {dimension_numbers = #tpu.dot_dimension_numbers<[1], [1], [0], [0], [0, 0, 1, 0], [], []>} : vector<8x8xbf16>, vector<16x8xbf16>, vector<8x16xf32> -> vector<8x16xf32>
    %cst_6 = arith.constant dense<0xFF800000> : vector<8xf32>
    %12 = vector.multi_reduction <maximumf>, %11, %cst_6 [1] : vector<8x16xf32> to vector<8xf32>
    %13 = vector.shape_cast %12 : vector<8xf32> to vector<8x1xf32>
    %14 = vector.broadcast %13 : vector<8x1xf32> to vector<8x16xf32>
    %15 = arith.subf %11, %14 : vector<8x16xf32>
    %16 = math.exp %15 : vector<8x16xf32>
    %cst_7 = arith.constant dense<0.000000e+00> : vector<8xf32>
    %17 = vector.multi_reduction <add>, %16, %cst_7 [1] : vector<8x16xf32> to vector<8xf32>
    %18 = vector.shape_cast %17 : vector<8xf32> to vector<8x1xf32>
    %19 = tpu.reciprocal %18 {approx = true} : vector<8x1xf32> -> vector<8x1xf32>
    %20 = vector.broadcast %19 : vector<8x1xf32> to vector<8x16xf32>
    %21 = arith.mulf %16, %20 : vector<8x16xf32>
    %22 = arith.truncf %21 : vector<8x16xf32> to vector<8x16xbf16>
    %cst_8 = arith.constant dense<0.000000e+00> : vector<8x8xf32>
    %23 = tpu.matmul %22, %10, %cst_8 {dimension_numbers = #tpu.dot_dimension_numbers<[1], [0], [0], [1], [0, 0, 1, 1], [], []>} : vector<8x16xbf16>, vector<16x8xbf16>, vector<8x8xf32> -> vector<8x8xf32>
    %24 = vector.extract_strided_slice %4 {offsets = [0, 8], sizes = [8, 8], strides = [1, 1]} : vector<8x32xbf16> to vector<8x8xbf16>
    %25 = vector.extract_strided_slice %7 {offsets = [0, 8], sizes = [16, 8], strides = [1, 1]} : vector<16x64xbf16> to vector<16x8xbf16>
    %26 = vector.extract_strided_slice %7 {offsets = [0, 40], sizes = [16, 8], strides = [1, 1]} : vector<16x64xbf16> to vector<16x8xbf16>
    %cst_9 = arith.constant dense<0.000000e+00> : vector<8x16xf32>
    %27 = tpu.matmul %24, %25, %cst_9 {dimension_numbers = #tpu.dot_dimension_numbers<[1], [1], [0], [0], [0, 0, 1, 0], [], []>} : vector<8x8xbf16>, vector<16x8xbf16>, vector<8x16xf32> -> vector<8x16xf32>
    %cst_10 = arith.constant dense<0xFF800000> : vector<8xf32>
    %28 = vector.multi_reduction <maximumf>, %27, %cst_10 [1] : vector<8x16xf32> to vector<8xf32>
    %29 = vector.shape_cast %28 : vector<8xf32> to vector<8x1xf32>
    %30 = vector.broadcast %29 : vector<8x1xf32> to vector<8x16xf32>
    %31 = arith.subf %27, %30 : vector<8x16xf32>
    %32 = math.exp %31 : vector<8x16xf32>
    %cst_11 = arith.constant dense<0.000000e+00> : vector<8xf32>
    %33 = vector.multi_reduction <add>, %32, %cst_11 [1] : vector<8x16xf32> to vector<8xf32>
    %34 = vector.shape_cast %33 : vector<8xf32> to vector<8x1xf32>
    %35 = tpu.reciprocal %34 {approx = true} : vector<8x1xf32> -> vector<8x1xf32>
    %36 = vector.broadcast %35 : vector<8x1xf32> to vector<8x16xf32>
    %37 = arith.mulf %32, %36 : vector<8x16xf32>
    %38 = arith.addf %21, %37 : vector<8x16xf32>
    %39 = arith.truncf %37 : vector<8x16xf32> to vector<8x16xbf16>
    %cst_12 = arith.constant dense<0.000000e+00> : vector<8x8xf32>
    %40 = tpu.matmul %39, %26, %cst_12 {dimension_numbers = #tpu.dot_dimension_numbers<[1], [0], [0], [1], [0, 0, 1, 1], [], []>} : vector<8x16xbf16>, vector<16x8xbf16>, vector<8x8xf32> -> vector<8x8xf32>
    %41 = vector.extract_strided_slice %4 {offsets = [0, 16], sizes = [8, 8], strides = [1, 1]} : vector<8x32xbf16> to vector<8x8xbf16>
    %42 = vector.extract_strided_slice %7 {offsets = [0, 16], sizes = [16, 8], strides = [1, 1]} : vector<16x64xbf16> to vector<16x8xbf16>
    %43 = vector.extract_strided_slice %7 {offsets = [0, 48], sizes = [16, 8], strides = [1, 1]} : vector<16x64xbf16> to vector<16x8xbf16>
    %cst_13 = arith.constant dense<0.000000e+00> : vector<8x16xf32>
    %44 = tpu.matmul %41, %42, %cst_13 {dimension_numbers = #tpu.dot_dimension_numbers<[1], [1], [0], [0], [0, 0, 1, 0], [], []>} : vector<8x8xbf16>, vector<16x8xbf16>, vector<8x16xf32> -> vector<8x16xf32>
    %cst_14 = arith.constant dense<0xFF800000> : vector<8xf32>
    %45 = vector.multi_reduction <maximumf>, %44, %cst_14 [1] : vector<8x16xf32> to vector<8xf32>
    %46 = vector.shape_cast %45 : vector<8xf32> to vector<8x1xf32>
    %47 = vector.broadcast %46 : vector<8x1xf32> to vector<8x16xf32>
    %48 = arith.subf %44, %47 : vector<8x16xf32>
    %49 = math.exp %48 : vector<8x16xf32>
    %cst_15 = arith.constant dense<0.000000e+00> : vector<8xf32>
    %50 = vector.multi_reduction <add>, %49, %cst_15 [1] : vector<8x16xf32> to vector<8xf32>
    %51 = vector.shape_cast %50 : vector<8xf32> to vector<8x1xf32>
    %52 = tpu.reciprocal %51 {approx = true} : vector<8x1xf32> -> vector<8x1xf32>
    %53 = vector.broadcast %52 : vector<8x1xf32> to vector<8x16xf32>
    %54 = arith.mulf %49, %53 : vector<8x16xf32>
    %55 = arith.addf %38, %54 : vector<8x16xf32>
    %56 = arith.truncf %54 : vector<8x16xf32> to vector<8x16xbf16>
    %cst_16 = arith.constant dense<0.000000e+00> : vector<8x8xf32>
    %57 = tpu.matmul %56, %43, %cst_16 {dimension_numbers = #tpu.dot_dimension_numbers<[1], [0], [0], [1], [0, 0, 1, 1], [], []>} : vector<8x16xbf16>, vector<16x8xbf16>, vector<8x8xf32> -> vector<8x8xf32>
    %58 = vector.extract_strided_slice %4 {offsets = [0, 24], sizes = [8, 8], strides = [1, 1]} : vector<8x32xbf16> to vector<8x8xbf16>
    %59 = vector.extract_strided_slice %7 {offsets = [0, 24], sizes = [16, 8], strides = [1, 1]} : vector<16x64xbf16> to vector<16x8xbf16>
    %60 = vector.extract_strided_slice %7 {offsets = [0, 56], sizes = [16, 8], strides = [1, 1]} : vector<16x64xbf16> to vector<16x8xbf16>
    %cst_17 = arith.constant dense<0.000000e+00> : vector<8x16xf32>
    %61 = tpu.matmul %58, %59, %cst_17 {dimension_numbers = #tpu.dot_dimension_numbers<[1], [1], [0], [0], [0, 0, 1, 0], [], []>} : vector<8x8xbf16>, vector<16x8xbf16>, vector<8x16xf32> -> vector<8x16xf32>
    %cst_18 = arith.constant dense<0xFF800000> : vector<8xf32>
    %62 = vector.multi_reduction <maximumf>, %61, %cst_18 [1] : vector<8x16xf32> to vector<8xf32>
    %63 = vector.shape_cast %62 : vector<8xf32> to vector<8x1xf32>
    %64 = vector.broadcast %63 : vector<8x1xf32> to vector<8x16xf32>
    %65 = arith.subf %61, %64 : vector<8x16xf32>
    %66 = math.exp %65 : vector<8x16xf32>
    %cst_19 = arith.constant dense<0.000000e+00> : vector<8xf32>
    %67 = vector.multi_reduction <add>, %66, %cst_19 [1] : vector<8x16xf32> to vector<8xf32>
    %68 = vector.shape_cast %67 : vector<8xf32> to vector<8x1xf32>
    %69 = tpu.reciprocal %68 {approx = true} : vector<8x1xf32> -> vector<8x1xf32>
    %70 = vector.broadcast %69 : vector<8x1xf32> to vector<8x16xf32>
    %71 = arith.mulf %66, %70 : vector<8x16xf32>
    %72 = arith.addf %55, %71 : vector<8x16xf32>
    %73 = arith.truncf %71 : vector<8x16xf32> to vector<8x16xbf16>
    %cst_20 = arith.constant dense<0.000000e+00> : vector<8x8xf32>
    %74 = tpu.matmul %73, %60, %cst_20 {dimension_numbers = #tpu.dot_dimension_numbers<[1], [0], [0], [1], [0, 0, 1, 1], [], []>} : vector<8x16xbf16>, vector<16x8xbf16>, vector<8x8xf32> -> vector<8x8xf32>
    %75 = tpu.concatenate %23, %40, %57, %74 in 1 : vector<8x8xf32>, vector<8x8xf32>, vector<8x8xf32>, vector<8x8xf32> -> vector<8x32xf32>
    %c0_21 = arith.constant 0 : index
    %c0_22 = arith.constant 0 : index
    %c0_23 = arith.constant 0 : index
    %76 = vector.load %arg4[%c0_21, %c0_22, %c0_23] : memref<1x8x32xf32, #tpu.memory_space<vmem>>, vector<1x8x32xf32>
    %77 = vector.shape_cast %76 : vector<1x8x32xf32> to vector<8x32xf32>
    %78 = vector.shape_cast %75 : vector<8x32xf32> to vector<1x8x32xf32>
    tpu.vector_store %arg4[%c0_21, %c0_22, %c0_23], %78 {strides = array<i32>} : memref<1x8x32xf32, #tpu.memory_space<vmem>>, vector<1x8x32xf32>,
    %cst_24 = arith.constant 2.500000e-01 : f32
    %79 = vector.broadcast %cst_24 : f32 to vector<8x16xf32>
    %80 = arith.mulf %72, %79 : vector<8x16xf32>
    %c0_25 = arith.constant 0 : index
    %c0_26 = arith.constant 0 : index
    %c0_27 = arith.constant 0 : index
    %81 = vector.load %arg5[%c0_25, %c0_26, %c0_27] : memref<1x8x16xf32, #tpu.memory_space<vmem>>, vector<1x8x16xf32>
    %82 = vector.shape_cast %81 : vector<1x8x16xf32> to vector<8x16xf32>
    %83 = vector.shape_cast %80 : vector<8x16xf32> to vector<1x8x16xf32>
    tpu.vector_store %arg5[%c0_25, %c0_26, %c0_27], %83 {strides = array<i32>} : memref<1x8x16xf32, #tpu.memory_space<vmem>>, vector<1x8x16xf32>,
    return
  }
  func.func @transform_0(%arg0: i32, %arg1: i32) -> (i32, i32, i32) {
    %c0_i32 = arith.constant 0 : i32
    %c0_i32_0 = arith.constant 0 : i32
    return %arg0, %arg1, %c0_i32 : i32, i32, i32
  }
  func.func @transform_1(%arg0: i32, %arg1: i32) -> (i32, i32, i32) {
    %c0_i32 = arith.constant 0 : i32
    %c0_i32_0 = arith.constant 0 : i32
    %c0_i32_1 = arith.constant 0 : i32
    return %arg0, %c0_i32, %c0_i32_0 : i32, i32, i32
  }
  func.func @transform_2(%arg0: i32, %arg1: i32) -> (i32, i32, i32) {
    %c0_i32 = arith.constant 0 : i32
    %c0_i32_0 = arith.constant 0 : i32
    return %arg0, %arg1, %c0_i32 : i32, i32, i32
  }
  func.func @transform_3(%arg0: i32, %arg1: i32) -> (i32, i32, i32) {
    %c0_i32 = arith.constant 0 : i32
    %c0_i32_0 = arith.constant 0 : i32
    return %arg0, %arg1, %c0_i32 : i32, i32, i32
  }
}

module attributes {stable_mosaic.version = 11 : i64} {
  func.func @_linear_kernel(%arg0: i32, %arg1: i32, %arg2: i32, %arg3: i32, %arg4: memref<1x16x48xf32, #tpu.memory_space<vmem>>, %arg5: memref<48x64xf32, #tpu.memory_space<vmem>>, %arg6: memref<1x64xf32, #tpu.memory_space<vmem>>, %arg7: memref<1x16x64xf32, #tpu.memory_space<vmem>>, %arg8: memref<16x64xf32, #tpu.memory_space<vmem>>) attributes {dimension_semantics = [#tpu.dimension_semantics<parallel>, #tpu.dimension_semantics<parallel>, #tpu.dimension_semantics<parallel>, #tpu.dimension_semantics<arbitrary>], iteration_bounds = array<i64: 2, 1, 1, 1>, scalar_prefetch = 0 : i64, scratch_operands = 1 : i64, tpu.core_type = #tpu.core_type<tc>, window_params = [{transform_indices = @transform_0, window_bounds = array<i64: 1, 16, 48>}, {transform_indices = @transform_1, window_bounds = array<i64: 48, 64>}, {transform_indices = @transform_2, window_bounds = array<i64: 1, 64>}, {transform_indices = @transform_3, window_bounds = array<i64: 1, 16, 64>}]} {
    %c0_i32 = arith.constant 0 : i32
    %0 = arith.cmpi eq, %arg3, %c0_i32 : i32
    %1 = arith.extui %0 : i1 to i32
    %c0_i32_0 = arith.constant 0 : i32
    %2 = arith.cmpi ne, %1, %c0_i32_0 : i32
    scf.if %2 {
      %cst_11 = arith.constant 0.000000e+00 : f32
      %15 = vector.broadcast %cst_11 : f32 to vector<16x64xf32>
      %c0_12 = arith.constant 0 : index
      %c0_13 = arith.constant 0 : index
      %16 = vector.load %arg8[%c0_12, %c0_13] : memref<16x64xf32, #tpu.memory_space<vmem>>, vector<16x64xf32>
      tpu.vector_store %arg8[%c0_12, %c0_13], %15 {strides = array<i32>} : memref<16x64xf32, #tpu.memory_space<vmem>>, vector<16x64xf32>,
    } else {
    }
    %c0 = arith.constant 0 : index
    %c0_1 = arith.constant 0 : index
    %c0_2 = arith.constant 0 : index
    %3 = vector.load %arg4[%c0, %c0_1, %c0_2] : memref<1x16x48xf32, #tpu.memory_space<vmem>>, vector<1x16x48xf32>
    %4 = vector.shape_cast %3 : vector<1x16x48xf32> to vector<16x48xf32>
    %5 = arith.truncf %4 : vector<16x48xf32> to vector<16x48xbf16>
    %c0_3 = arith.constant 0 : index
    %c0_4 = arith.constant 0 : index
    %6 = vector.load %arg5[%c0_3, %c0_4] : memref<48x64xf32, #tpu.memory_space<vmem>>, vector<48x64xf32>
    %7 = arith.truncf %6 : vector<48x64xf32> to vector<48x64xbf16>
    %c0_5 = arith.constant 0 : index
    %c0_6 = arith.constant 0 : index
    %8 = vector.load %arg8[%c0_5, %c0_6] : memref<16x64xf32, #tpu.memory_space<vmem>>, vector<16x64xf32>
    %cst = arith.constant dense<0.000000e+00> : vector<16x64xf32>
    %9 = tpu.matmul %5, %7, %cst {dimension_numbers = #tpu.dot_dimension_numbers<[1], [0], [0], [1], [0, 0, 1, 1], [], []>} : vector<16x48xbf16>, vector<48x64xbf16>, vector<16x64xf32> -> vector<16x64xf32>
    %10 = arith.addf %8, %9 : vector<16x64xf32>
    %c0_7 = arith.constant 0 : index
    %c0_8 = arith.constant 0 : index
    %11 = vector.load %arg8[%c0_7, %c0_8] : memref<16x64xf32, #tpu.memory_space<vmem>>, vector<16x64xf32>
    tpu.vector_store %arg8[%c0_7, %c0_8], %10 {strides = array<i32>} : memref<16x64xf32, #tpu.memory_space<vmem>>, vector<16x64xf32>,
    %c0_i32_9 = arith.constant 0 : i32
    %12 = arith.cmpi eq, %arg3, %c0_i32_9 : i32
    %13 = arith.extui %12 : i1 to i32
    %c0_i32_10 = arith.constant 0 : i32
    %14 = arith.cmpi ne, %13, %c0_i32_10 : i32
    scf.if %14 {
      %c0_11 = arith.constant 0 : index
      %c0_12 = arith.constant 0 : index
      %15 = vector.load %arg8[%c0_11, %c0_12] : memref<16x64xf32, #tpu.memory_space<vmem>>, vector<16x64xf32>
      %c0_13 = arith.constant 0 : index
      %c0_14 = arith.constant 0 : index
      %16 = vector.load %arg6[%c0_13, %c0_14] : memref<1x64xf32, #tpu.memory_space<vmem>>, vector<1x64xf32>
      %17 = vector.broadcast %16 : vector<1x64xf32> to vector<16x64xf32>
      %18 = arith.addf %15, %17 : vector<16x64xf32>
      %c0_15 = arith.constant 0 : index
      %c0_16 = arith.constant 0 : index
      %c0_17 = arith.constant 0 : index
      %19 = vector.load %arg7[%c0_15, %c0_16, %c0_17] : memref<1x16x64xf32, #tpu.memory_space<vmem>>, vector<1x16x64xf32>
      %20 = vector.shape_cast %19 : vector<1x16x64xf32> to vector<16x64xf32>
      %21 = vector.shape_cast %18 : vector<16x64xf32> to vector<1x16x64xf32>
      tpu.vector_store %arg7[%c0_15, %c0_16, %c0_17], %21 {strides = array<i32>} : memref<1x16x64xf32, #tpu.memory_space<vmem>>, vector<1x16x64xf32>,
    } else {
    }
    return
  }
  func.func @transform_0(%arg0: i32, %arg1: i32, %arg2: i32, %arg3: i32) -> (i32, i32, i32) {
    %c0_i32 = arith.constant 0 : i32
    return %arg0, %arg1, %arg3 : i32, i32, i32
  }
  func.func @transform_1(%arg0: i32, %arg1: i32, %arg2: i32, %arg3: i32) -> (i32, i32) {
    %c0_i32 = arith.constant 0 : i32
    return %arg3, %arg2 : i32, i32
  }
  func.func @transform_2(%arg0: i32, %arg1: i32, %arg2: i32, %arg3: i32) -> (i32, i32) {
    %c0_i32 = arith.constant 0 : i32
    %c0_i32_0 = arith.constant 0 : i32
    return %c0_i32, %arg2 : i32, i32
  }
  func.func @transform_3(%arg0: i32, %arg1: i32, %arg2: i32, %arg3: i32) -> (i32, i32, i32) {
    %c0_i32 = arith.constant 0 : i32
    return %arg0, %arg1, %arg2 : i32, i32, i32
  }
}

module attributes {stable_mosaic.version = 11 : i64} {
  func.func @_linear_kernel(%arg0: i32, %arg1: i32, %arg2: i32, %arg3: i32, %arg4: memref<1x8x32xf32, #tpu.memory_space<vmem>>, %arg5: memref<32x32xf32, #tpu.memory_space<vmem>>, %arg6: memref<1x32xf32, #tpu.memory_space<vmem>>, %arg7: memref<1x8x32xf32, #tpu.memory_space<vmem>>, %arg8: memref<8x32xf32, #tpu.memory_space<vmem>>) attributes {dimension_semantics = [#tpu.dimension_semantics<parallel>, #tpu.dimension_semantics<parallel>, #tpu.dimension_semantics<parallel>, #tpu.dimension_semantics<arbitrary>], iteration_bounds = array<i64: 2, 1, 1, 1>, scalar_prefetch = 0 : i64, scratch_operands = 1 : i64, tpu.core_type = #tpu.core_type<tc>, window_params = [{transform_indices = @transform_0, window_bounds = array<i64: 1, 8, 32>}, {transform_indices = @transform_1, window_bounds = array<i64: 32, 32>}, {transform_indices = @transform_2, window_bounds = array<i64: 1, 32>}, {transform_indices = @transform_3, window_bounds = array<i64: 1, 8, 32>}]} {
    %c0_i32 = arith.constant 0 : i32
    %0 = arith.cmpi eq, %arg3, %c0_i32 : i32
    %1 = arith.extui %0 : i1 to i32
    %c0_i32_0 = arith.constant 0 : i32
    %2 = arith.cmpi ne, %1, %c0_i32_0 : i32
    scf.if %2 {
      %cst_11 = arith.constant 0.000000e+00 : f32
      %15 = vector.broadcast %cst_11 : f32 to vector<8x32xf32>
      %c0_12 = arith.constant 0 : index
      %c0_13 = arith.constant 0 : index
      %16 = vector.load %arg8[%c0_12, %c0_13] : memref<8x32xf32, #tpu.memory_space<vmem>>, vector<8x32xf32>
      tpu.vector_store %arg8[%c0_12, %c0_13], %15 {strides = array<i32>} : memref<8x32xf32, #tpu.memory_space<vmem>>, vector<8x32xf32>,
    } else {
    }
    %c0 = arith.constant 0 : index
    %c0_1 = arith.constant 0 : index
    %c0_2 = arith.constant 0 : index
    %3 = vector.load %arg4[%c0, %c0_1, %c0_2] : memref<1x8x32xf32, #tpu.memory_space<vmem>>, vector<1x8x32xf32>
    %4 = vector.shape_cast %3 : vector<1x8x32xf32> to vector<8x32xf32>
    %5 = arith.truncf %4 : vector<8x32xf32> to vector<8x32xbf16>
    %c0_3 = arith.constant 0 : index
    %c0_4 = arith.constant 0 : index
    %6 = vector.load %arg5[%c0_3, %c0_4] : memref<32x32xf32, #tpu.memory_space<vmem>>, vector<32x32xf32>
    %7 = arith.truncf %6 : vector<32x32xf32> to vector<32x32xbf16>
    %c0_5 = arith.constant 0 : index
    %c0_6 = arith.constant 0 : index
    %8 = vector.load %arg8[%c0_5, %c0_6] : memref<8x32xf32, #tpu.memory_space<vmem>>, vector<8x32xf32>
    %cst = arith.constant dense<0.000000e+00> : vector<8x32xf32>
    %9 = tpu.matmul %5, %7, %cst {dimension_numbers = #tpu.dot_dimension_numbers<[1], [0], [0], [1], [0, 0, 1, 1], [], []>} : vector<8x32xbf16>, vector<32x32xbf16>, vector<8x32xf32> -> vector<8x32xf32>
    %10 = arith.addf %8, %9 : vector<8x32xf32>
    %c0_7 = arith.constant 0 : index
    %c0_8 = arith.constant 0 : index
    %11 = vector.load %arg8[%c0_7, %c0_8] : memref<8x32xf32, #tpu.memory_space<vmem>>, vector<8x32xf32>
    tpu.vector_store %arg8[%c0_7, %c0_8], %10 {strides = array<i32>} : memref<8x32xf32, #tpu.memory_space<vmem>>, vector<8x32xf32>,
    %c0_i32_9 = arith.constant 0 : i32
    %12 = arith.cmpi eq, %arg3, %c0_i32_9 : i32
    %13 = arith.extui %12 : i1 to i32
    %c0_i32_10 = arith.constant 0 : i32
    %14 = arith.cmpi ne, %13, %c0_i32_10 : i32
    scf.if %14 {
      %c0_11 = arith.constant 0 : index
      %c0_12 = arith.constant 0 : index
      %15 = vector.load %arg8[%c0_11, %c0_12] : memref<8x32xf32, #tpu.memory_space<vmem>>, vector<8x32xf32>
      %c0_13 = arith.constant 0 : index
      %c0_14 = arith.constant 0 : index
      %16 = vector.load %arg6[%c0_13, %c0_14] : memref<1x32xf32, #tpu.memory_space<vmem>>, vector<1x32xf32>
      %17 = vector.broadcast %16 : vector<1x32xf32> to vector<8x32xf32>
      %18 = arith.addf %15, %17 : vector<8x32xf32>
      %c0_15 = arith.constant 0 : index
      %c0_16 = arith.constant 0 : index
      %c0_17 = arith.constant 0 : index
      %19 = vector.load %arg7[%c0_15, %c0_16, %c0_17] : memref<1x8x32xf32, #tpu.memory_space<vmem>>, vector<1x8x32xf32>
      %20 = vector.shape_cast %19 : vector<1x8x32xf32> to vector<8x32xf32>
      %21 = vector.shape_cast %18 : vector<8x32xf32> to vector<1x8x32xf32>
      tpu.vector_store %arg7[%c0_15, %c0_16, %c0_17], %21 {strides = array<i32>} : memref<1x8x32xf32, #tpu.memory_space<vmem>>, vector<1x8x32xf32>,
    } else {
    }
    return
  }
  func.func @transform_0(%arg0: i32, %arg1: i32, %arg2: i32, %arg3: i32) -> (i32, i32, i32) {
    %c0_i32 = arith.constant 0 : i32
    return %arg0, %arg1, %arg3 : i32, i32, i32
  }
  func.func @transform_1(%arg0: i32, %arg1: i32, %arg2: i32, %arg3: i32) -> (i32, i32) {
    %c0_i32 = arith.constant 0 : i32
    return %arg3, %arg2 : i32, i32
  }
  func.func @transform_2(%arg0: i32, %arg1: i32, %arg2: i32, %arg3: i32) -> (i32, i32) {
    %c0_i32 = arith.constant 0 : i32
    %c0_i32_0 = arith.constant 0 : i32
    return %c0_i32, %arg2 : i32, i32
  }
  func.func @transform_3(%arg0: i32, %arg1: i32, %arg2: i32, %arg3: i32) -> (i32, i32, i32) {
    %c0_i32 = arith.constant 0 : i32
    return %arg0, %arg1, %arg2 : i32, i32, i32
  }
}

</mosaic_0001>

<bundles_post_ra>
// kernel: cross_attention_forward.7
= control target key start
LH: loop header
LB: loop body
LE: loop exit
PB: predicated region body
PF: predicated region fallthrough
CT: control target
= control target key end

     0   :  { %8 = vsyncpa [#allocation4], 0  ;;  %s763_s0 = inlined_call_operand.vmem [shape: f32[2,8,32], index: 0, kind: input, shape index: {}]   ;;  %s764_s1 = inlined_call_operand.hbm [shape: f32[32,32], index: 1, kind: input, shape index: {}]   ;;  %s765_s2 = inlined_call_operand.vmem [shape: f32[1,32], index: 2, kind: input, shape index: {}]   ;;  %s766_s3 = inlined_call_operand.hbm [shape: f32[2,8,32], index: 3, kind: output, shape index: {}]  }
   0x1   :  { %9 = vsyncpa [#allocation5], 0 }
   0x2   :  { %11 = vsyncpa [#allocation5 + $0x1], 0  ;;  %s656_s12 = smov 0   ;;  %s658_s13 = smov 0  }
   0x3   :  { %s660_s14 = smov 0   ;;  %s662_s15 = smov 0  }
   0x4   :  { %s664_s16 = smov 0   ;;  %s666_s17 = smov 0  }
   0x5 LB: > { %s433_s18 = sadd.s32 4294967295, %s630_s17   ;;  %s434_s19 = sadd.s32 4294967294, %s630_s17   ;;  %s630_s17 = sphi %s666_s17, %s17_s17   ;;  %s626_s16 = sphi %s664_s16, %s773_s16   ;;  %s622_s15 = sphi %s662_s15, %s772_s15   ;;  %s618_s14 = sphi %s660_s14, %s771_s14   ;;  %s614_s13 = sphi %s658_s13, %s770_s13   ;;  %s610_s12 = sphi %s656_s12, %s769_s12  }
   0x6   : > { %s43_s20 = sadd.s32 1, %s626_s16  ;;  %s138_s21 = sadd.s32 1, %s618_s14 }
   0x7   : > { %p45_p0 = scmp.ge.s32.totalorder %s43_s20, 2  ;;  %p148_p1 = scmp.ne.s32.totalorder %s618_s14, %s614_s13 }
   0x8   : > { %p149_p2 = scmp.eq.s32.totalorder %s433_s18, 1  ;;  %p154_p3 = scmp.ne.s32.totalorder %s614_s13, %s610_s12 }
   0x9   : > { %s775_s20 = smov (%p45_p0, %s43_s20), 0  ;;  %p155_p5 = scmp.eq.s32.totalorder %s434_s19, 1 }
   0xa   : > { %p696_p4 = por %p149_p2, %p148_p1  ;;  %s131_s23 = ssub.s32 %s626_s16, %s775_s20 }
   0xb   : > { %p435_p6 = scmp.ge.s32.totalorder %s630_s17, 1  ;;  %p136_p7 = scmp.eq.s32.totalorder %s131_s23, 0 }
   0xc   : > { %p703_p8 = por %p155_p5, %p154_p3  ;;  %p162_p9 = scmp.lt.s32.totalorder %s630_s17, 3 }
   0xd   : > { %s709_s25 = scalar_select %p136_p7, %s618_s14, %s138_s21  }
   0xe   : > { %p163_p10 = pnand %p435_p6, %p162_p9  ;;  %p462_p11 = scmp.eq.s32.totalorder %s433_s18, 0 }
   0xf   : > { %s177_s28 = sshll.u32 %s764_s1, 4  ;;  %s632_s29 = smov [#allocation3]   ;;  %s178_s28 = int_to_ptr.hbm [resolvable:$true] %s177_s28 }
  0x10   : > { %p454_p12 = pneg %p163_p10  ;;  %s179_s30 = sshll.u32 %s632_s29, 4  ;;  %s180_s30 = int_to_ptr.vmem [resolvable:$true] %s179_s30 }
  0x11   : > { %s633_s4 = smov 128   ;;  %s634_s5 = smov 8  }
  0x12   : > { %p455_p13 = pnand %p462_p11, %p454_p12  ;;  %214 = sbr.rel (%p163_p10) target bundleno = 176 (0xb0), region = 32 }
  0x14   : > { %457 = dma.hbm_to_vmem [thread:$0]  (!%p455_p13), %s178_s28, 512, %s180_s30, [#allocation4], %s633_s4, %s633_s4, %s634_s5  }
  0x17   : > { %601 = dma.done.wait (%p462_p11), [#allocation4], 512  }
  0x18   : > { %603 = vsyncadd (%p462_p11), [#allocation4], 4294966784  ;;  %p247_p0 = scmp.lt.s32.totalorder %s622_s15, 1  ;;  %vm266_vm0 = vcmask 261120   ;;  %v635_v0 = vmov 0.0   ;;  %v272_v1 = vld [vmem:[#allocation3 + $0x10] sm:$0xff] }
  0x19   : > { %267 = vst.msk [vmem:[#allocation2] sm:$0xff] %vm266_vm0, %v635_v0  ;;  %v273_v2 = vld [vmem:[#allocation3 + $0x18] sm:$0xff]  ;;  %v270_v3 = vld [vmem:[#allocation3] sm:$0xff]  ;;  %v271_v5 = vld [vmem:[#allocation3 + $0x8] sm:$0xff]  ;;  %s244_s11 = sand.u32 1, %s614_s13   ;;  %s445_s19 = sshll.u32 %s622_s15, 3 }
  0x1a   : > { %s248_s6 = scalar_select %p247_p0, %s622_s15, 1  ;;  %v275_v4 = vpack.c.bf16 %v273_v2, %v272_v1  ;;  %v274_v6 = vpack.c.bf16 %v271_v5, %v270_v3  ;;  %v517_v12 = vld [vmem:[%s765_s2] ss:$0 sm:$0xff] }
  0x1b   : > { %s441_s18 = sshll.u32 %s244_s11, 3  ;;  %s319_s26 = scalar_lea.hbm %s766_s3, %s445_s19 }
  0x1c   : > { %s442_s7 = sshll.u32 %s248_s6, 3  ;;  %287 = vmatpush.bf16.msra.mxu0 %v275_v4  ;;  %s246_s29 = scalar_lea.vmem [#allocation6], %s441_s18 }
  0x1d   : > { %s256_s10 = scalar_lea.vmem %s763_s0, %s442_s7  ;;  %s321_s30 = sshll.u32 %s246_s29, 4  ;;  %s322_s30 = int_to_ptr.vmem [resolvable:$true] %s321_s30 }
  0x1e   : > { %v268_v7 = vld [vmem:[%s256_s10] sm:$0xff]  ;;  %s323_s4 = sshll.u32 %s319_s26, 4  ;;  %s307_s15 = scalar_lea.sflag [#allocation5], %s244_s11  ;;  %s324_s4 = int_to_ptr.hbm [resolvable:$true] %s323_s4 }
  0x1f   : > { %v269_v8 = vpack.c.bf16 %v268_v7, %v268_v7  ;;  %s562_s5 = sshra.s32 %s324_s4, 4  ;;  %s568_s9 = scalar_lea.hbm %s766_s3, 16  ;;  %s563_s5 = int_to_ptr.hbm [resolvable:$true] %s562_s5 }
  0x20   : > { %288 = vmatpush.bf16.msra.mxu0 %v274_v6  ;;  %v276_v9 = vld [vmem:[#allocation2] sm:$0xff]  ;;  %s564_s6 = scalar_lea.hbm %s563_s5, 8  ;;  %p569_p5 = scmp.lt.s32.totalorder %s563_s5, %s766_s3 }
  0x21   : > { %p565_p1 = scmp.ne.s32.totalorder %s563_s5, %s564_s6  ;;  %p570_p6 = scmp.lt.s32.totalorder %s568_s9, %s564_s6 }
  0x23   : > { %443 = vmatmul.msk.bf16.vlgmr.msra.gmra.mxu0 %vm266_vm0, %v269_v8  ;;  %p566_p2 = pnand %p565_p1, %p696_p4  ;;  %p571_p7 = por %p570_p6, %p569_p5 }
  0x25   : > { %p567_p3 = pneg %p566_p2 }
  0x27   : > { %p572_p9 = pnand %p571_p7, %p567_p3 }
  0xa0   : > { %v290_v10 = vpop.f32.mrf.mxu0 }
  0xa1   : > { %v294_v11 = vadd.f32 %v290_v10, %v276_v9 }
  0xa3   : > { %295 = vst.msk [vmem:[#allocation2] sm:$0xff] %vm266_vm0, %v294_v11 }
  0xa8   : > { %v292_v13 = vpop.f32.mrf.mxu0 }
  0xaa   : > { %v299_v14 = vld [vmem:[#allocation2] sm:$0xff] }
  0xab   : > { %v304_v15 = vadd.f32 %v517_v12, %v299_v14 }
  0xad   : > { %305 = vst.msk [vmem:[%s246_s29] sm:$0xff] %vm266_vm0, %v304_v15 }
  0xae   : > { %575 = shalt.err (!%p572_p9)
}
  0xaf   : > { %452 = dma.vmem_to_hbm [thread:$0]  (%p696_p4), %s322_s30, 128, %s324_s4, %s307_s15  }
  0xb0 PF: > { %p464_p10 = scmp.ge.s32.totalorder %s630_s17, 2  ;;  %s335_s11 = sand.u32 1, %s610_s12  }
  0xb1   : > { %s336_s19 = scalar_lea.sflag [#allocation5], %s335_s11 }
  0xb2   : > { %p459_p11 = pnand %p464_p10, %p703_p8 }
  0xb4   : > { %p460_p12 = pneg %p459_p11 }
  0xb6   : > { %605 = dma.done.wait (%p460_p12), %s336_s19, 128  }
  0xb7   : > { %607 = vsyncadd (%p460_p12), %s336_s19, 4294967168  ;;  %s17_s17 = sadd.s32 1, %s630_s17   ;;  %s769_s12 = smov %s614_s13 }
  0xb8   : > { %p14_p13 = scmp.ge.s32.totalorder %s17_s17, 4   ;;  %s770_s13 = smov %s618_s14 }
  0xb9   : > { %s771_s14 = smov %s709_s25  ;;  %s772_s15 = smov %s626_s16 }
  0xba   : > { %s773_s16 = smov %s775_s20  ;;  %16 = sbr.rel (!%p14_p13) target bundleno = 5 (0x5), region = 84 }
  0xbf   :  { %342 = vsyncpa [#allocation4], 1 }
  0xc0   :  { %344 = vsyncpa [#allocation4 + $0x1], 1 }
  0xc1   :  { %345 = vsyncpa [#allocation5], 1 }
  0xc2   :  { %347 = vsyncpa [#allocation5 + $0x1], 1 }

// kernel: cross_attention_forward.4
= control target key start
LH: loop header
LB: loop body
LE: loop exit
PB: predicated region body
PF: predicated region fallthrough
CT: control target
= control target key end

     0   :  { %8 = vsyncpa [#allocation4], 0  ;;  %s797_s0 = inlined_call_operand.hbm [shape: f32[2,8,32], index: 0, kind: input, shape index: {}]   ;;  %s798_s1 = inlined_call_operand.hbm [shape: f32[32,32], index: 1, kind: input, shape index: {}]   ;;  %s799_s2 = inlined_call_operand.vmem [shape: f32[1,32], index: 2, kind: input, shape index: {}]   ;;  %s800_s3 = inlined_call_operand.vmem [shape: f32[2,8,32], index: 3, kind: output, shape index: {}]  }
   0x1   :  { %10 = vsyncpa [#allocation4 + $0x1], 0 }
   0x2   :  { %11 = vsyncpa [#allocation6], 0  ;;  %s676_s12 = smov 0   ;;  %s678_s13 = smov 0  }
   0x3   :  { %s680_s14 = smov 0   ;;  %s682_s15 = smov 0  }
   0x4   :  { %s684_s16 = smov 0   ;;  %s686_s17 = smov 0  }
   0x5 LB: > { %s451_s18 = sadd.s32 4294967295, %s650_s17   ;;  %p453_p0 = scmp.ge.s32.totalorder %s650_s17, 1  ;;  %s650_s17 = sphi %s686_s17, %s17_s17   ;;  %s646_s16 = sphi %s684_s16, %s809_s16   ;;  %s642_s15 = sphi %s682_s15, %s808_s15   ;;  %s638_s14 = sphi %s680_s14, %s807_s14   ;;  %s634_s13 = sphi %s678_s13, %s806_s13   ;;  %s630_s12 = sphi %s676_s12, %s805_s12  }
   0x6   : > { %p708_p1 = scmp.eq.s32.totalorder %s451_s18, 0  ;;  %p162_p2 = scmp.lt.s32.totalorder %s650_s17, 3 }
   0x7   : > { %s177_s22 = sshll.u32 %s798_s1, 4  ;;  %s652_s24 = smov [#allocation5]   ;;  %s178_s22 = int_to_ptr.hbm [resolvable:$true] %s177_s22 }
   0x8   : > { %p716_p3 = pnand %p453_p0, %p162_p2  ;;  %s179_s25 = sshll.u32 %s652_s24, 4  ;;  %s180_s25 = int_to_ptr.vmem [resolvable:$true] %s179_s25 }
   0x9   : > { %s653_s26 = smov 128   ;;  %s654_s27 = smov 8  }
   0xa   : > { %p472_p4 = pneg %p716_p3  ;;  %s43_s28 = sadd.s32 1, %s646_s16 }
   0xb   : > { %p45_p6 = scmp.ge.s32.totalorder %s43_s28, 2  ;;  %p61_p7 = scmp.ne.s32.totalorder %s638_s14, %s634_s13 }
   0xc   : > { %p473_p5 = pnand %p472_p4, %p708_p1  ;;  %p62_p8 = scmp.eq.s32.totalorder %s650_s17, 0 }
   0xd   : > { %s811_s28 = smov (%p45_p6, %s43_s28), 0  ;;  %s54_s29 = sadd.s32 1, %s638_s14 }
   0xe   : > { %475 = dma.hbm_to_vmem [thread:$0]  (!%p473_p5), %s178_s22, 512, %s180_s25, [#allocation6], %s653_s26, %s653_s26, %s654_s27  }
   0xf   : > { %p67_p9 = scmp.ne.s32.totalorder %s634_s13, %s630_s12  ;;  %s47_s30 = ssub.s32 %s646_s16, %s811_s28 }
  0x10   : > { %p735_p10 = por %p62_p8, %p61_p7  ;;  %p52_p11 = scmp.eq.s32.totalorder %s47_s30, 0 }
  0x11   : > { %p741_p12 = por %p708_p1, %p67_p9  ;;  %s199_s6 = sand.u32 1, %s638_s14  }
  0x12   : > { %s458_s7 = sshll.u32 %s646_s16, 3  ;;  %p481_p13 = scmp.lt.s32.totalorder %s650_s17, 2 }
  0x13   : > { %s748_s8 = scalar_select %p52_p11, %s638_s14, %s54_s29  }
  0x14   : > { %s457_s9 = sshll.u32 %s199_s6, 3  ;;  %s209_s12 = scalar_lea.hbm %s797_s0, %s458_s7 }
  0x15   : > { %s211_s18 = sshll.u32 %s209_s12, 4  ;;  %s203_s20 = scalar_lea.vmem [#allocation3], %s457_s9  ;;  %s212_s18 = int_to_ptr.hbm [resolvable:$true] %s211_s18 }
  0x16   : > { %s213_s21 = sshll.u32 %s203_s20, 4  ;;  %p477_p0 = pnand %p481_p13, %p735_p10  ;;  %s214_s21 = int_to_ptr.vmem [resolvable:$true] %s213_s21 }
  0x17   : > { %s200_s22 = scalar_lea.sflag [#allocation4], %s199_s6  ;;  %222 = sbr.rel (%p716_p3) target bundleno = 180 (0xb4), region = 32 }
  0x18   : > { %479 = dma.hbm_to_vmem [thread:$0]  (!%p477_p0), %s212_s18, 128, %s214_s21, %s200_s22  }
  0x19   : > { %s224_s24 = sand.u32 (!%p716_p3), 1, %s634_s13  }
  0x1a   : > { %s460_s25 = sshll.u32 (!%p716_p3), %s224_s24, 3  ;;  %s225_s26 = scalar_lea.sflag (!%p716_p3), [#allocation4], %s224_s24 }
  0x1b   : > { %s228_s27 = scalar_lea.vmem (!%p716_p3), [#allocation3], %s460_s25 }
  0x1c   : > { %621 = dma.done.wait (%p741_p12), %s225_s26, 128  }
  0x1d   : > { %623 = vsyncadd (%p741_p12), %s225_s26, 4294967168 }
  0x1e   : > { %625 = dma.done.wait (%p708_p1), [#allocation6], 512  }
  0x1f   : > { %627 = vsyncadd (%p708_p1), [#allocation6], 4294966784  ;;  %vm284_vm0 = vcmask 261120   ;;  %v655_v0 = vmov 0.0   ;;  %v290_v1 = vld [vmem:[#allocation5 + $0x10] sm:$0xff]  ;;  %v291_v2 = vld [vmem:[#allocation5 + $0x18] sm:$0xff] }
  0x20   : > { %285 = vst.msk [vmem:[#allocation2] sm:$0xff] %vm284_vm0, %v655_v0  ;;  %v288_v3 = vld [vmem:[#allocation5] sm:$0xff]  ;;  %v293_v4 = vpack.c.bf16 %v291_v2, %v290_v1  ;;  %v289_v5 = vld [vmem:[#allocation5 + $0x8] sm:$0xff]  ;;  %v286_v7 = vld [vmem:[%s228_s27] sm:$0xff]  ;;  %p269_p1 = scmp.lt.s32.totalorder %s642_s15, 1 }
  0x21   : > { %v292_v6 = vpack.c.bf16 %v289_v5, %v288_v3  ;;  %v287_v8 = vpack.c.bf16 %v286_v7, %v286_v7  ;;  %v535_v12 = vld [vmem:[%s799_s2] ss:$0 sm:$0xff] }
  0x22   : > { %305 = vmatpush.bf16.msra.mxu0 %v293_v4  ;;  %s813_s15 = smov (!%p269_p1, %s642_s15), 1 }
  0x23   : > { %s462_s19 = sshll.u32 %s813_s15, 3 }
  0x24   : > { %s278_s5 = scalar_lea.vmem %s800_s3, %s462_s19 }
  0x26   : > { %306 = vmatpush.bf16.msra.mxu0 %v292_v6 }
  0x27   : > { %v294_v9 = vld [vmem:[#allocation2] sm:$0xff] }
  0x29   : > { %463 = vmatmul.msk.bf16.vlgmr.msra.gmra.mxu0 %vm284_vm0, %v287_v8 }
  0xa6   : > { %v308_v10 = vpop.f32.mrf.mxu0 }
  0xa7   : > { %v312_v11 = vadd.f32 %v308_v10, %v294_v9 }
  0xa9   : > { %313 = vst.msk [vmem:[#allocation2] sm:$0xff] %vm284_vm0, %v312_v11 }
  0xae   : > { %v310_v13 = vpop.f32.mrf.mxu0 }
  0xb0   : > { %v317_v14 = vld [vmem:[#allocation2] sm:$0xff] }
  0xb1   : > { %v322_v15 = vadd.f32 %v535_v12, %v317_v14 }
  0xb3   : > { %323 = vst.msk [vmem:[%s278_s5] sm:$0xff] %vm284_vm0, %v322_v15 }
  0xb4 PF: > { %s17_s17 = sadd.s32 1, %s650_s17   ;;  %s805_s12 = smov %s634_s13 }
  0xb5   : > { %p14_p2 = scmp.ge.s32.totalorder %s17_s17, 4   ;;  %s806_s13 = smov %s638_s14 }
  0xb6   : > { %s807_s14 = smov %s748_s8  ;;  %s808_s15 = smov %s646_s16 }
  0xb7   : > { %s809_s16 = smov %s811_s28  ;;  %16 = sbr.rel (!%p14_p2) target bundleno = 5 (0x5), region = 88 }
  0xbc   :  { %355 = vsyncpa [#allocation4], 1 }
  0xbd   :  { %357 = vsyncpa [#allocation4 + $0x1], 1 }
  0xbe   :  { %358 = vsyncpa [#allocation6], 1 }

// kernel: cross_attention_forward.5
= control target key start
LH: loop header
LB: loop body
LE: loop exit
PB: predicated region body
PF: predicated region fallthrough
CT: control target
= control target key end

     0   :  { %8 = vsyncpa [#allocation4], 0  ;;  %s834_s0 = inlined_call_operand.hbm [shape: f32[2,16,48], index: 0, kind: input, shape index: {}]   ;;  %s835_s1 = inlined_call_operand.hbm [shape: f32[48,64], index: 1, kind: input, shape index: {}]   ;;  %s836_s2 = inlined_call_operand.vmem [shape: f32[1,64], index: 2, kind: input, shape index: {}]   ;;  %s837_s3 = inlined_call_operand.vmem [shape: f32[2,16,64], index: 3, kind: output, shape index: {}]  }
   0x1   :  { %10 = vsyncpa [#allocation4 + $0x1], 0 }
   0x2   :  { %11 = vsyncpa [#allocation6], 0  ;;  %s714_s12 = smov 0   ;;  %s716_s13 = smov 0  }
   0x3   :  { %s718_s14 = smov 0   ;;  %s720_s15 = smov 0  }
   0x4   :  { %s722_s16 = smov 0   ;;  %s724_s17 = smov 0  }
   0x5 LB: > { %s485_s18 = sadd.s32 4294967295, %s688_s17   ;;  %p67_p0 = scmp.ne.s32.totalorder %s672_s13, %s668_s12  ;;  %s688_s17 = sphi %s724_s17, %s17_s17   ;;  %s684_s16 = sphi %s722_s16, %s846_s16   ;;  %s680_s15 = sphi %s720_s15, %s845_s15   ;;  %s676_s14 = sphi %s718_s14, %s844_s14   ;;  %s672_s13 = sphi %s716_s13, %s843_s13   ;;  %s668_s12 = sphi %s714_s12, %s842_s12  }
   0x6   : > { %p744_p1 = scmp.eq.s32.totalorder %s485_s18, 0  ;;  %p487_p2 = scmp.ge.s32.totalorder %s688_s17, 1 }
   0x7   : > { %p162_p3 = scmp.lt.s32.totalorder %s688_s17, 3  ;;  %s177_s23 = sshll.u32 %s835_s1, 4  ;;  %s178_s23 = int_to_ptr.hbm [resolvable:$true] %s177_s23 }
   0x8   : > { %p752_p4 = por %p744_p1, %p67_p0  ;;  %s690_s25 = smov [#allocation5]  }
   0x9   : > { %p759_p5 = pnand %p487_p2, %p162_p3  ;;  %s179_s26 = sshll.u32 %s690_s25, 4  ;;  %s180_s26 = int_to_ptr.vmem [resolvable:$true] %s179_s26 }
   0xa   : > { %s691_s27 = smov 128   ;;  %s692_s28 = smov 8  }
   0xb   : > { %p510_p6 = pneg %p759_p5  ;;  %s43_s29 = sadd.s32 1, %s684_s16 }
   0xc   : > { %p45_p8 = scmp.ge.s32.totalorder %s43_s29, 2  ;;  %p61_p9 = scmp.ne.s32.totalorder %s676_s14, %s672_s13 }
   0xd   : > { %p511_p7 = pnand %p510_p6, %p744_p1  ;;  %p62_p10 = scmp.eq.s32.totalorder %s688_s17, 0 }
   0xe   : > { %s848_s29 = smov (%p45_p8, %s43_s29), 0  ;;  %s54_s30 = sadd.s32 1, %s676_s14 }
   0xf   : > { %513 = dma.hbm_to_vmem [thread:$0]  (!%p511_p7), %s178_s23, 768, %s180_s26, [#allocation6], %s691_s27, %s691_s27, %s692_s28  }
  0x10   : > { %p774_p11 = por %p62_p10, %p61_p9  ;;  %s47_s5 = ssub.s32 %s684_s16, %s848_s29 }
  0x11   : > { %s199_s6 = sand.u32 1, %s676_s14   ;;  %p52_p12 = scmp.eq.s32.totalorder %s47_s5, 0 }
  0x12   : > { %p519_p13 = scmp.lt.s32.totalorder %s688_s17, 2  ;;  %s491_s7 = sshll.u32 %s199_s6, 4 }
  0x13   : > { %s502_s8 = sshll.u32 %s684_s16, 4  ;;  %s203_s21 = scalar_lea.vmem [#allocation3], %s491_s7 }
  0x14   : > { %s784_s9 = scalar_select %p52_p12, %s676_s14, %s54_s30  }
  0x15   : > { %s211_s12 = scalar_lea.hbm %s834_s0, %s502_s8  ;;  %s214_s22 = sshll.u32 %s203_s21, 4  ;;  %s215_s22 = int_to_ptr.vmem [resolvable:$true] %s214_s22 }
  0x16   : > { %s212_s18 = sshll.u32 %s211_s12, 4  ;;  %p515_p0 = pnand %p519_p13, %p774_p11  ;;  %s213_s18 = int_to_ptr.hbm [resolvable:$true] %s212_s18 }
  0x17   : > { %s200_s23 = scalar_lea.sflag [#allocation4], %s199_s6  ;;  %226 = sbr.rel (%p759_p5) target bundleno = 192 (0xc0), region = 32 }
  0x18   : > { %517 = dma.hbm_to_vmem [thread:$0]  (!%p515_p0), %s213_s18, 256, %s215_s22, %s200_s23, %s691_s27, %s691_s27, %s692_s28  }
  0x19   : > { %s228_s25 = sand.u32 (!%p759_p5), 1, %s672_s13  }
  0x1a   : > { %s495_s26 = sshll.u32 (!%p759_p5), %s228_s25, 4  ;;  %s229_s30 = scalar_lea.sflag (!%p759_p5), [#allocation4], %s228_s25 }
  0x1b   : > { %s232_s5 = scalar_lea.vmem (!%p759_p5), [#allocation3], %s495_s26 }
  0x1c   : > { %659 = dma.done.wait (%p752_p4), %s229_s30, 256  }
  0x1d   : > { %661 = vsyncadd (%p752_p4), %s229_s30, 4294967040 }
  0x1e   : > { %663 = dma.done.wait (%p744_p1), [#allocation6], 768  }
  0x1f   : > { %665 = vsyncadd (%p744_p1), [#allocation6], 4294966528  ;;  %vm294_vm0 = vcmask 523264   ;;  %v693_v0 = vmov 0.0   ;;  %v304_v1 = vld [vmem:[#allocation5 + $0x20] sm:$0xff]  ;;  %v305_v2 = vld [vmem:[#allocation5 + $0x28] sm:$0xff] }
  0x20   : > { %295 = vst.msk [vmem:[#allocation2] sm:$0xff] %vm294_vm0, %v693_v0  ;;  %v302_v3 = vld [vmem:[#allocation5 + $0x10] sm:$0xff]  ;;  %v308_v4 = vpack.c.bf16 %v305_v2, %v304_v1  ;;  %v303_v5 = vld [vmem:[#allocation5 + $0x18] sm:$0xff]  ;;  %v300_v7 = vld [vmem:[#allocation5] sm:$0xff]  ;;  %vm311_vm1 = vcmask 392192   ;;  %p277_p1 = scmp.lt.s32.totalorder %s680_s15, 1 }
  0x21   : > { %296 = vst.msk [vmem:[#allocation2 + $0x8] sm:$0xff] %vm294_vm0, %v693_v0  ;;  %v307_v6 = vpack.c.bf16 %v303_v5, %v302_v3  ;;  %v301_v8 = vld [vmem:[#allocation5 + $0x8] sm:$0xff]  ;;  %v297_v10 = vld [vmem:[%s232_s5] sm:$0xff] }
  0x22   : > { %320 = vmatpush.bf16.msra.mxu0 %v308_v4  ;;  %v306_v9 = vpack.c.bf16 %v301_v8, %v300_v7  ;;  %v298_v11 = vld [vmem:[%s232_s5 + $0x8] sm:$0xff]  ;;  %s850_s15 = smov (!%p277_p1, %s680_s15), 1  ;;  %v573_v17 = vld [vmem:[%s836_s2] ss:$0 sm:$0xff] }
  0x23   : > { %v299_v12 = vpack.c.bf16 %v298_v11, %v297_v10  ;;  %s503_s19 = sshll.u32 %s850_s15, 4 }
  0x24   : > { %s287_s4 = scalar_lea.vmem %s837_s3, %s503_s19 }
  0x26   : > { %321 = vmatpush.bf16.msra.mxu0 %v307_v6 }
  0x27   : > { %v309_v13 = vld [vmem:[#allocation2] sm:$0xff] }
  0x28   : > { %v310_v16 = vld [vmem:[#allocation2 + $0x8] sm:$0xff] }
  0x2a   : > { %322 = vmatpush.bf16.msra.mxu0 %v306_v9 }
  0x2d   : > { %499 = vmatmul.msk.bf16.vlgmr.msra.gmra.mxu0 %vm311_vm1, %v299_v12 }
  0xaa   : > { %v324_v14 = vpop.f32.mrf.mxu0 }
  0xab   : > { %v329_v15 = vadd.f32 %v324_v14, %v309_v13 }
  0xad   : > { %332 = vst.msk [vmem:[#allocation2] sm:$0xff] %vm294_vm0, %v329_v15 }
  0xb2   : > { %v326_v18 = vpop.f32.mrf.mxu0 }
  0xb3   : > { %v330_v19 = vadd.f32 %v326_v18, %v310_v16 }
  0xb4   : > { %v337_v20 = vld [vmem:[#allocation2] sm:$0xff] }
  0xb5   : > { %v343_v21 = vadd.f32 %v573_v17, %v337_v20  ;;  %333 = vst.msk [vmem:[#allocation2 + $0x8] sm:$0xff] %vm294_vm0, %v330_v19 }
  0xb7   : > { %345 = vst.msk [vmem:[%s287_s4] sm:$0xff] %vm294_vm0, %v343_v21 }
  0xbc   : > { %v338_v22 = vld [vmem:[#allocation2 + $0x8] sm:$0xff] }
  0xbd   : > { %v344_v23 = vadd.f32 %v573_v17, %v338_v22 }
  0xbf   : > { %346 = vst.msk [vmem:[%s287_s4 + $0x8] sm:$0xff] %vm294_vm0, %v344_v23 }
  0xc0 PF: > { %s17_s17 = sadd.s32 1, %s688_s17   ;;  %s842_s12 = smov %s672_s13 }
  0xc1   : > { %p14_p2 = scmp.ge.s32.totalorder %s17_s17, 4   ;;  %s843_s13 = smov %s676_s14 }
  0xc2   : > { %s844_s14 = smov %s784_s9  ;;  %s845_s15 = smov %s684_s16 }
  0xc3   : > { %s846_s16 = smov %s848_s29  ;;  %16 = sbr.rel (!%p14_p2) target bundleno = 5 (0x5), region = 88 }
  0xc8   :  { %383 = vsyncpa [#allocation4], 1 }
  0xc9   :  { %385 = vsyncpa [#allocation4 + $0x1], 1 }
  0xca   :  { %386 = vsyncpa [#allocation6], 1 }

// kernel: cross_attention_forward.6
= control target key start
LH: loop header
LB: loop body
LE: loop exit
PB: predicated region body
PF: predicated region fallthrough
CT: control target
= control target key end

     0   :  { %9 = vsyncpa [#allocation3], 0  ;;  %s985_s0 = inlined_call_operand.vmem [shape: f32[2,8,32], index: 0, kind: input, shape index: {}]   ;;  %s986_s1 = inlined_call_operand.vmem [shape: f32[2,16,64], index: 1, kind: input, shape index: {}]   ;;  %s987_s2 = inlined_call_operand.vmem [shape: f32[2,8,32], index: 2, kind: output, shape index: {0}]   ;;  %s988_s3 = inlined_call_operand.hbm [shape: f32[2,8,16], index: 3, kind: output, shape index: {1}]  }
   0x1   :  { %11 = vsyncpa [#allocation3 + $0x1], 0  ;;  %s838_s12 = smov 0   ;;  %s840_s13 = smov 0  }
   0x2   :  { %s842_s14 = smov 0   ;;  %s844_s15 = smov 0  }
   0x3   :  { %s846_s16 = smov 0   ;;  %s848_s17 = smov 0  }
   0x4 LB: > { %s624_s18 = sadd.s32 4294967295, %s806_s17   ;;  %s625_s19 = sadd.s32 4294967294, %s806_s17   ;;  %s806_s17 = sphi %s848_s17, %s17_s17   ;;  %s802_s16 = sphi %s846_s16, %s995_s16   ;;  %s798_s15 = sphi %s844_s15, %s994_s15   ;;  %s794_s14 = sphi %s842_s14, %s993_s14   ;;  %s790_s13 = sphi %s840_s13, %s992_s13   ;;  %s786_s12 = sphi %s838_s12, %s991_s12  }
   0x5   : > { %s29_s20 = sadd.s32 1, %s802_s16  ;;  %s120_s21 = sadd.s32 1, %s794_s14 }
   0x6   : > { %p31_p0 = scmp.ge.s32.totalorder %s29_s20, 2  ;;  %p130_p1 = scmp.ne.s32.totalorder %s794_s14, %s790_s13 }
   0x7   : > { %p131_p2 = scmp.eq.s32.totalorder %s624_s18, 1  ;;  %p136_p3 = scmp.ne.s32.totalorder %s790_s13, %s786_s12 }
   0x8   : > { %s997_s20 = smov (%p31_p0, %s29_s20), 0  ;;  %p137_p5 = scmp.eq.s32.totalorder %s625_s19, 1 }
   0x9   : > { %p878_p4 = por %p131_p2, %p130_p1  ;;  %s115_s23 = ssub.s32 %s802_s16, %s997_s20 }
   0xa   : > { %p628_p6 = scmp.ge.s32.totalorder %s806_s17, 1  ;;  %p118_p7 = scmp.eq.s32.totalorder %s115_s23, 0 }
   0xb   : > { %p885_p8 = por %p137_p5, %p136_p3  ;;  %p173_p9 = scmp.lt.s32.totalorder %s806_s17, 3 }
   0xc   : > { %s891_s25 = scalar_select %p118_p7, %s794_s14, %s120_s21  }
   0xd   : > { %p174_p10 = pnand %p628_p6, %p173_p9 }
   0xe   : > { %p211_p11 = scmp.lt.s32.totalorder (!%p174_p10), %s798_s15, 1  ;;  %s808_s8 = smov (!%p174_p10), 96  }
   0xf   : > { %177 = sbr.rel (%p174_p10) target bundleno = 1088 (0x440), region = 28  ;;  %s809_s9 = smov (!%p174_p10), 112  }
  0x10   : > { %s810_s10 = smov (!%p174_p10), 104   ;;  %s811_s11 = smov (!%p174_p10), 120  }
  0x11   : > { %s812_s18 = smov (!%p174_p10), 88   ;;  %s813_s19 = smov (!%p174_p10), 80  }
  0x12   : > { %s814_s21 = smov (!%p174_p10), 72   ;;  %s208_s23 = sand.u32 (!%p174_p10), 1, %s790_s13  }
  0x13   : > { %s815_s30 = smov (!%p174_p10), 8  }
  0x14   : > { %s895_s26 = scalar_select %p211_p11, %s798_s15, 1  ;;  %vm243_vm0 = vcmask 64512   ;;  %vm263_vm1 = vcmask 130048  }
  0x16   : > { %s646_s27 = sshll.u32 %s895_s26, 4  ;;  %s630_s28 = sshll.u32 %s895_s26, 3 }
  0x17   : > { %s222_s4 = scalar_lea.vmem %s986_s1, %s646_s27  ;;  %s217_s7 = scalar_lea.vmem %s985_s0, %s630_s28 }
  0x18   : > { %v234_v0 = vld [vmem:[%s222_s4] sm:$0xff]  ;;  %v235_v1 = vld [vmem:[%s222_s4 + $0x8] sm:$0xff]  ;;  %s629_s27 = sshll.u32 %s208_s23, 3  ;;  %s643_s4 = sshll.u32 %s798_s15, 3 }
  0x19   : > { %v236_v2 = vpack.c.bf16 %v234_v0, %v234_v0  ;;  %v237_v3 = vpack.c.bf16 %v235_v1, %v235_v1  ;;  %v231_v6 = vld [vmem:[%s217_s7] sm:$0xff]  ;;  %s210_s29 = scalar_lea.vmem [#allocation2], %s629_s27  ;;  %s505_s7 = scalar_lea.hbm %s988_s3, %s643_s4 }
  0x1a   : > { %v232_v9 = vmul.f32 0.35355338, %v231_v6  ;;  %s748_s15 = scalar_lea.hbm %s988_s3, 16 }
  0x1b   : > { %v240_v4 = vunpack.c.l.b16 %v236_v2  ;;  %v241_v5 = vunpack.c.l.b16 %v237_v3 }
  0x1c   : > { %v233_v10 = vpack.c.bf16 %v232_v9, %v232_v9 }
  0x1d   : > { %v907_v7 = vpack.c.b16 %v241_v5, %v240_v4 }
  0x1e   : > { %v296_v11 = vunpack.c.l.b16 %v233_v10 }
  0x1f   : > { %v248_v8 = vsel %vm243_vm0, %v907_v7, 0  ;;  %276 = vrot.lane.b32.xlu2 %v907_v7, %s808_s8  ;;  %s507_s8 = sshll.u32 %s210_s29, 4  ;;  %s508_s8 = int_to_ptr.vmem [resolvable:$true] %s507_s8 }
  0x20   : > { %257 = vmatpush.bf16.xpose.msra.mxu0 %v248_v8  ;;  %v297_v12 = vpack.c.b16 %v296_v11, %v296_v11 }
  0x27   : > { %634 = vmatmul.msk.bf16.vlgmr.msra.gmra.mxu0 %vm243_vm0, %v233_v10  ;;  %355 = vrot.lane.b32.xlu2 %v907_v7, %s809_s9 }
  0x2f   : > { %410 = vrot.lane.b32.xlu2 %v907_v7, %s810_s10 }
  0x37   : > { %353 = vrot.lane.b32.xlu2 %v297_v12, %s809_s9  ;;  %s509_s9 = sshll.u32 %s505_s7, 4  ;;  %s510_s9 = int_to_ptr.hbm [resolvable:$true] %s509_s9 }
  0x79   : > { %v277_v16 = vpop.permute.xlu2 %276 }
  0x7a   : > { %289 = vmatpush.bf16.msra.mxu1 %v277_v16 }
  0x81   : > { %v356_v17 = vpop.permute.xlu2 %355 }
  0x82   : > { %v361_v27 = vsel %vm243_vm0, %v356_v17, 0 }
  0x83   : > { %370 = vmatpush.bf16.xpose.msrb.mxu1 %v361_v27 }
  0x89   : > { %v411_v21 = vpop.permute.xlu2 %410 }
  0x8a   : > { %v416_v22 = vsel %vm243_vm0, %v411_v21, 0 }
  0x8b   : > { %425 = vmatpush.bf16.xpose.msrb.mxu0 %v416_v22 }
  0x91   : > { %v354_v34 = vpop.permute.xlu2 %353 }
  0xa4   : > { %v259_v13 = vpop.f32.mrf.mxu0 }
  0xa5   : > { %v264_v14 = vsel %vm263_vm1, %v259_v13, -inf }
  0xa6   : > { %265 = vmax.xlane.f32.xlu0 %v264_v14 }
  0xac   : > { %v261_v15 = vpop.f32.mrf.mxu0 }
  0xba   : > { %300 = vrot.lane.b32.xlu0 %v907_v7, %s811_s11 }
  0xc2   : > { %408 = vrot.lane.b32.xlu0 %v297_v12, %s810_s10  ;;  %s491_s10 = scalar_lea.sflag [#allocation3], %s208_s23 }
 0x119   : > { %v266_v18 = vpop.xlane.xlu0 %265 }
 0x11a   : > { %v267_v19 = vsub.f32 %v259_v13, %v266_v18 }
 0x11c   : > { %v268_v20 = vmul.f32 1.442695, %v267_v19 }
 0x11e   : > { %712 = vpow2.f32 %v268_v20 }
 0x124   : > { %v713_v23 = vpop.eup %712 }
 0x125   : > { %v270_v24 = vsel %vm263_vm1, %v713_v23, 0.0 }
 0x126   : > { %271 = vadd.xlane.f32.xlu1 %v270_v24 }
 0x12c   : > { %v301_v25 = vpop.permute.xlu0 %300 }
 0x12d   : > { %v306_v28 = vsel %vm243_vm0, %v301_v25, 0 }
 0x12e   : > { %315 = vmatpush.bf16.xpose.msra.mxu2 %v306_v28 }
 0x134   : > { %v409_v26 = vpop.permute.xlu0 %408 }
 0x135   : > { %640 = vmatmul.msk.bf16.vlgmr.msrb.gmra.mxu0 %vm243_vm0, %v409_v26 }
 0x13f   : > { %298 = vrot.lane.b32.xlu1 %v297_v12, %s811_s11  ;;  %s742_s11 = sshra.s32 %s510_s9, 4  ;;  %s743_s11 = int_to_ptr.hbm [resolvable:$true] %s742_s11 }
 0x140   : > { %p749_p1 = scmp.lt.s32.totalorder %s743_s11, %s988_s3 }
 0x199   : > { %v272_v29 = vpop.xlane.xlu1 %271 }
 0x19a   : > { %714 = vrcp.f32 %v272_v29 }
 0x1a0   : > { %v715_v30 = vpop.eup %714 }
 0x1a1   : > { %v274_v31 = vmul.f32 %v715_v30, %v713_v23 }
 0x1a3   : > { %v275_v32 = vpack.c.bf16 %v274_v31, %v274_v31 }
 0x1a5   : > { %635 = vmatmul.msk.bf16.vlgmr.msra.gmra.mxu1 %vm263_vm1, %v275_v32 }
 0x1b1   : > { %v299_v33 = vpop.permute.xlu1 %298 }
 0x1b2   : > { %636 = vmatmul.msk.bf16.vlgmr.msra.gmra.mxu2 %vm243_vm0, %v299_v33  ;;  %v427_v35 = vpop.f32.mrf.mxu0 }
 0x1b3   : > { %v431_v36 = vsel %vm263_vm1, %v427_v35, -inf }
 0x1b4   : > { %432 = vmax.xlane.f32.xlu0 %v431_v36 }
 0x1b5   : > { %638 = vmatmul.msk.bf16.vlgmr.msrb.gmra.mxu1 %vm243_vm0, %v354_v34 }
 0x1ba   : > { %v429_v37 = vpop.f32.mrf.mxu0 }
 0x222   : > { %v926_v38 = vpop.f32.mrf.mxu1 }
 0x227   : > { %v433_v48 = vpop.xlane.xlu0 %432 }
 0x228   : > { %v434_v52 = vsub.f32 %v427_v35, %v433_v48 }
 0x22a   : > { %v293_v39 = vpop.f32.mrf.mxu1  ;;  %v435_v54 = vmul.f32 1.442695, %v434_v52 }
 0x232   : > { %v372_v40 = vpop.f32.mrf.mxu1 }
 0x233   : > { %v376_v41 = vsel %vm263_vm1, %v372_v40, -inf }
 0x234   : > { %377 = vmax.xlane.f32.xlu1 %v376_v41 }
 0x235   : > { %v317_v42 = vpop.f32.mrf.mxu2 }
 0x236   : > { %v321_v43 = vsel %vm263_vm1, %v317_v42, -inf }
 0x237   : > { %322 = vmax.xlane.f32.xlu2 %v321_v43 }
 0x23a   : > { %v374_v44 = vpop.f32.mrf.mxu1 }
 0x23d   : > { %v319_v45 = vpop.f32.mrf.mxu2 }
 0x24d   : > { %334 = vrot.lane.b32.xlu1 %v907_v7, %s812_s18  ;;  %s744_s18 = scalar_lea.hbm %s743_s11, 8 }
 0x24e   : > { %p745_p12 = scmp.ne.s32.totalorder %s743_s11, %s744_s18  ;;  %p750_p2 = scmp.lt.s32.totalorder %s748_s15, %s744_s18 }
 0x250   : > { %p746_p13 = pnand %p745_p12, %p878_p4  ;;  %p751_p3 = por %p750_p2, %p749_p1 }
 0x252   : > { %p747_p0 = pneg %p746_p13 }
 0x254   : > { %p752_p5 = pnand %p751_p3, %p747_p0 }
 0x2a7   : > { %v378_v46 = vpop.xlane.xlu1 %377 }
 0x2a8   : > { %v379_v47 = vsub.f32 %v372_v40, %v378_v46 }
 0x2aa   : > { %v380_v49 = vmul.f32 1.442695, %v379_v47  ;;  %v323_v50 = vpop.xlane.xlu2 %322 }
 0x2ab   : > { %v324_v51 = vsub.f32 %v317_v42, %v323_v50 }
 0x2ac   : > { %716 = vpow2.f32 %v380_v49 }
 0x2ad   : > { %v325_v53 = vmul.f32 1.442695, %v324_v51 }
 0x2af   : > { %718 = vpow2.f32 %v325_v53 }
 0x2b0   : > { %720 = vpow2.f32 %v435_v54 }
 0x2b2   : > { %v717_v55 = vpop.eup %716 }
 0x2b3   : > { %v382_v56 = vsel %vm263_vm1, %v717_v55, 0.0 }
 0x2b4   : > { %383 = vadd.xlane.f32.xlu0 %v382_v56 }
 0x2b5   : > { %v719_v57 = vpop.eup %718 }
 0x2b6   : > { %v327_v58 = vsel %vm263_vm1, %v719_v57, 0.0  ;;  %v721_v59 = vpop.eup %720 }
 0x2b7   : > { %328 = vadd.xlane.f32.xlu2 %v327_v58  ;;  %v437_v60 = vsel %vm263_vm1, %v721_v59, 0.0 }
 0x2bf   : > { %438 = vadd.xlane.f32.xlu2 %v437_v60  ;;  %v335_v61 = vpop.permute.xlu1 %334 }
 0x2c0   : > { %347 = vmatpush.bf16.msra.mxu3 %v335_v61 }
 0x2c8   : > { %389 = vrot.lane.b32.xlu0 %v907_v7, %s813_s19 }
 0x2d7   : > { %444 = vrot.lane.b32.xlu2 %v907_v7, %s814_s21 }
 0x327   : > { %v384_v63 = vpop.xlane.xlu0 %383 }
 0x32a   : > { %v329_v62 = vpop.xlane.xlu2 %328 }
 0x32b   : > { %722 = vrcp.f32 %v329_v62 }
 0x32c   : > { %724 = vrcp.f32 %v384_v63 }
 0x331   : > { %v723_v0 = vpop.eup %722 }
 0x332   : > { %v439_v1 = vpop.xlane.xlu2 %438  ;;  %v331_v2 = vmul.f32 %v723_v0, %v719_v57  ;;  %v725_v4 = vpop.eup %724 }
 0x333   : > { %726 = vrcp.f32 %v439_v1  ;;  %v386_v6 = vmul.f32 %v725_v4, %v717_v55 }
 0x334   : > { %v333_v3 = vpack.c.bf16 %v331_v2, %v331_v2  ;;  %v332_v5 = vadd.f32 %v331_v2, %v274_v31 }
 0x335   : > { %v388_v15 = vpack.c.bf16 %v386_v6, %v386_v6 }
 0x336   : > { %637 = vmatmul.msk.bf16.vlgmr.msra.gmra.mxu3 %vm263_vm1, %v333_v3  ;;  %v387_v7 = vadd.f32 %v386_v6, %v332_v5 }
 0x339   : > { %v727_v8 = vpop.eup %726 }
 0x33a   : > { %v441_v9 = vmul.f32 %v727_v8, %v721_v59  ;;  %v445_v10 = vpop.permute.xlu2 %444  ;;  %v390_v11 = vpop.permute.xlu0 %389 }
 0x33b   : > { %402 = vmatpush.bf16.msrb.mxu3 %v390_v11  ;;  %457 = vmatpush.bf16.msrb.mxu2 %v445_v10 }
 0x33c   : > { %v443_v12 = vpack.c.bf16 %v441_v9, %v441_v9  ;;  %v442_v13 = vadd.f32 %v441_v9, %v387_v7 }
 0x33e   : > { %641 = vmatmul.msk.bf16.vlgmr.msrb.gmra.mxu2 %vm263_vm1, %v443_v12  ;;  %v481_v14 = vmul.f32 0.25, %v442_v13 }
 0x340   : > { %482 = vst.msk [vmem:[%s210_s29] sm:$0xff] %vm263_vm1, %v481_v14 }
 0x346   : > { %639 = vmatmul.msk.bf16.vlgmr.msrb.gmra.mxu3 %vm263_vm1, %v388_v15 }
 0x3b9   : > { %v349_v16 = vpop.f32.mrf.mxu3 }
 0x3ba   : > { %464 = vrot.lane.b32.xlu1 %v349_v16, %s815_s30 }
 0x3bb   : > { %755 = shalt.err (!%p752_p5)
}
 0x3bc   : > { %647 = dma.vmem_to_hbm [thread:$0]  (%p878_p4), %s508_s8, 128, %s510_s9, %s491_s10   ;;  %vm477_vm2 = vcmask 195584   ;;  %vm479_vm3 = vcmask 261120  }
 0x3bd   : > { %s816_s23 = smov 24   ;;  %s817_s29 = smov 16  }
 0x3be   : > { %s229_s6 = scalar_lea.vmem %s987_s2, %s630_s28 }
 0x3c1   : > { %v351_v17 = vpop.f32.mrf.mxu3  ;;  %v459_v18 = vpop.f32.mrf.mxu2 }
 0x3c2   : > { %472 = vrot.lane.b32.xlu1 %v459_v18, %s816_s23 }
 0x3c9   : > { %v404_v19 = vpop.f32.mrf.mxu3  ;;  %v461_v20 = vpop.f32.mrf.mxu2 }
 0x3ca   : > { %468 = vrot.lane.b32.xlu0 %v404_v19, %s817_s29 }
 0x3d1   : > { %v406_v21 = vpop.f32.mrf.mxu3 }
 0x42c   : > { %v465_v22 = vpop.permute.xlu1 %464 }
 0x42d   : > { %v475_v23 = vsel %vm243_vm0, %v926_v38, %v465_v22 }
 0x434   : > { %v473_v25 = vpop.permute.xlu1 %472 }
 0x43c   : > { %v469_v24 = vpop.permute.xlu0 %468 }
 0x43d   : > { %v476_v26 = vsel %vm263_vm1, %v475_v23, %v469_v24 }
 0x43e   : > { %v478_v27 = vsel %vm477_vm2, %v476_v26, %v473_v25 }
 0x43f   : > { %480 = vst.msk [vmem:[%s229_s6] sm:$0xff] %vm479_vm3, %v478_v27 }
 0x440 PF: > { %p653_p4 = scmp.ge.s32.totalorder %s806_s17, 2  ;;  %s531_s22 = sand.u32 1, %s786_s12  }
 0x441   : > { %s532_s26 = scalar_lea.sflag [#allocation3], %s531_s22 }
 0x442   : > { %p650_p6 = pnand %p653_p4, %p885_p8 }
 0x444   : > { %p651_p7 = pneg %p650_p6 }
 0x446   : > { %781 = dma.done.wait (%p651_p7), %s532_s26, 128  }
 0x447   : > { %783 = vsyncadd (%p651_p7), %s532_s26, 4294967168  ;;  %s17_s17 = sadd.s32 1, %s806_s17   ;;  %s991_s12 = smov %s790_s13 }
 0x448   : > { %p14_p9 = scmp.ge.s32.totalorder %s17_s17, 4   ;;  %s992_s13 = smov %s794_s14 }
 0x449   : > { %s993_s14 = smov %s891_s25  ;;  %s994_s15 = smov %s802_s16 }
 0x44a   : > { %s995_s16 = smov %s997_s20  ;;  %16 = sbr.rel (!%p14_p9) target bundleno = 4 (0x4), region = 78 }
 0x44f   :  { %538 = vsyncpa [#allocation3], 1 }
 0x450   :  { %540 = vsyncpa [#allocation3 + $0x1], 1 }

</bundles_post_ra>
